<compile_context>
chip_gen: v7x
topology: tpu7x:2x2x1
jax: 0.10.0
libtpu: 0.0.40
codegen_flags: <defaults>
</compile_context>

<pallas_src>
import jax
import jax.numpy as jnp
from jax.experimental import pallas as pl
from jax.experimental.pallas import tpu as pltpu

NEG_INF = -1e30   # bias for padded logit lanes (exp underflows to exactly 0)
D_IN, D_H1, D_H2, D_OUT, D_PAD = 784, 128, 64, 10, 128


def mlp_kernel(x_ref, w1_ref, b1_ref, w2_ref, b2_ref, w3_ref, b3_ref, o_ref):
    # In-kernel f32 -> bf16 cast of the activation tile (VPU has slack; avoids a
    # separate wrapper-side astype pass over HBM).
    xb = x_ref[...].astype(jnp.bfloat16)
    # fc1: bf16 MXU matmul, f32 accumulate; bias + ReLU in f32
    h1 = jnp.dot(xb, w1_ref[...], preferred_element_type=jnp.float32)
    h1 = jnp.maximum(h1 + b1_ref[...], 0.0)
    # fc2 (output padded 64 -> 128 with zero weights/bias: mathematically inert)
    h2 = jnp.dot(h1.astype(jnp.bfloat16), w2_ref[...],
                 preferred_element_type=jnp.float32)
    h2 = jnp.maximum(h2 + b2_ref[...], 0.0)
    # fc3 (output padded 10 -> 128; padded columns get bias = -1e30)
    logits = jnp.dot(h2.astype(jnp.bfloat16), w3_ref[...],
                     preferred_element_type=jnp.float32)
    logits = logits + b3_ref[...]
    # numerically stable softmax over the feature axis; padded lanes -> exactly 0
    m = jnp.max(logits, axis=1, keepdims=True)
    e = jnp.exp(logits - m)
    denom = jnp.sum(e, axis=1, keepdims=True)
    probs = e * pl.reciprocal(denom, approx=False)
    # store only the 10 real classes (narrow, masked store; write-byte saving
    # dominates since the kernel is HBM-bound and the store slot has slack)
    o_ref[...] = probs[:, :D_OUT].astype(o_ref.dtype)


def _round_up(v, m):
    return ((v + m - 1) // m) * m


def mlp_forward(x, w1, b1, w2, b2, w3, b3, *, block_b=1024):
    """x: [B, 784] f32; weights stored [in, out]; returns [B, 10] f32 softmax."""
    B, d_in = x.shape
    assert d_in == D_IN

    # Batch tile: large enough to amortize per-step overhead, multiple of 256,
    # >=2 grid steps for large batches (v7x megacore), and sized so double-
    # buffered f32 activations + f32 intermediates fit v5e's 16 MiB default
    # scoped VMEM (~9 MB at TB=1024).
    if B >= 512:
        TB = min(block_b, _round_up(pl.cdiv(B, 2), 256))
    else:
        TB = B  # single step; block dims equal full array dims -> legal spec
    grid = (pl.cdiv(B, TB),)

    # Lane-dense padding of fc2/fc3 (zero weights contribute nothing; padded
    # logit columns get -1e30 bias so softmax ignores them). Weights are tiny,
    # so this one-time wrapper-side work is negligible.
    w2p = jnp.pad(w2, ((0, 0), (0, D_PAD - D_H2)))
    b2p = jnp.pad(b2, (0, D_PAD - D_H2))
    w3p = jnp.pad(w3, ((0, D_PAD - D_H2), (0, D_PAD - D_OUT)))
    b3p = jnp.pad(b3, (0, D_PAD - D_OUT), constant_values=NEG_INF)

    w1b = w1.astype(jnp.bfloat16)
    w2b = w2p.astype(jnp.bfloat16)
    w3b = w3p.astype(jnp.bfloat16)
    b1r = b1.reshape(1, -1).astype(jnp.float32)
    b2r = b2p.reshape(1, -1).astype(jnp.float32)
    b3r = b3p.reshape(1, -1).astype(jnp.float32)

    const = lambda shape: pl.BlockSpec(shape, lambda i: (0, 0))

    cost = pl.CostEstimate(
        flops=2 * B * (D_IN * D_H1 + D_H1 * D_PAD + D_PAD * D_PAD),
        transcendentals=B * D_PAD,
        bytes_accessed=(B * D_IN * 4 + B * D_OUT * 4                         # x in, out
                        + (D_IN * D_H1 + D_H1 * D_PAD + D_PAD * D_PAD) * 2   # weights
                        + 3 * D_PAD * 4),                                    # biases
    )

    out = pl.pallas_call(
        mlp_kernel,
        out_shape=jax.ShapeDtypeStruct((B, D_OUT), jnp.float32),
        grid=grid,
        in_specs=[
            pl.BlockSpec((TB, D_IN), lambda i: (i, 0)),  # batch-tiled activations (f32)
            const(w1b.shape),                            # weights stay VMEM-resident
            const(b1r.shape),
            const(w2b.shape),
            const(b2r.shape),
            const(w3b.shape),
            const(b3r.shape),
        ],
        out_specs=pl.BlockSpec((TB, D_OUT), lambda i: (i, 0)),
        compiler_params=pltpu.CompilerParams(
            dimension_semantics=("parallel",)),          # megacore on v7x
        cost_estimate=cost,
    )(x, w1b, b1r, w2b, b2r, w3b, b3r)

    return out


def init_params(key):
    """Deterministic init mimicking nn.Linear's U(-1/sqrt(fan_in), 1/sqrt(fan_in))."""
    dims = [(D_IN, D_H1), (D_H1, D_H2), (D_H2, D_OUT)]
    params = []
    for fan_in, fan_out in dims:
        kw, kb, key = jax.random.split(key, 3)
        bound = 1.0 / jnp.sqrt(fan_in)
        w = jax.random.uniform(kw, (fan_in, fan_out), jnp.float32, -bound, bound)
        b = jax.random.uniform(kb, (fan_out,), jnp.float32, -bound, bound)
        params += [w, b]
    return params


if __name__ == "__main__":
    key = jax.random.PRNGKey(0)
    kx, kp = jax.random.split(key)

    B = 8
    x = jax.random.normal(kx, (B, D_IN), dtype=jnp.float32)
    w1, b1, w2, b2, w3, b3 = init_params(kp)

    out = jax.block_until_ready(mlp_forward(x, w1, b1, w2, b2, w3, b3))
    assert out.shape == (B, D_OUT)

    # softmax rows must sum to 1 (padded lanes contribute exactly 0)
    assert jnp.allclose(jnp.sum(out, axis=1), 1.0, atol=1e-4)

    # reference with matching bf16-matmul numerics (tight tolerance)
    def ref_bf16(x, w1, b1, w2, b2, w3, b3):
        h1 = jnp.maximum(jnp.dot(x.astype(jnp.bfloat16), w1.astype(jnp.bfloat16),
                                 preferred_element_type=jnp.float32) + b1, 0.0)
        h2 = jnp.maximum(jnp.dot(h1.astype(jnp.bfloat16), w2.astype(jnp.bfloat16),
                                 preferred_element_type=jnp.float32) + b2, 0.0)
        logits = jnp.dot(h2.astype(jnp.bfloat16), w3.astype(jnp.bfloat16),
                         preferred_element_type=jnp.float32) + b3
        return jax.nn.softmax(logits, axis=1)

    ref = ref_bf16(x, w1, b1, w2, b2, w3, b3)
    assert jnp.allclose(out, ref, atol=2e-3), float(jnp.max(jnp.abs(out - ref)))

    # full f32 reference (original module semantics), bf16-loose tolerance
    h1 = jnp.maximum(x @ w1 + b1, 0.0)
    h2 = jnp.maximum(h1 @ w2 + b2, 0.0)
    ref32 = jax.nn.softmax(h2 @ w3 + b3, axis=1)
    assert jnp.allclose(out, ref32, atol=3e-2)

    print("KERNEL_OK")
</pallas_src>

<mosaic_0001>
module attributes {stable_mosaic.version = 11 : i64} {
  func.func @mlp_kernel(%arg0: i32, %arg1: memref<8x784xf32, #tpu.memory_space<vmem>>, %arg2: memref<784x128xbf16, #tpu.memory_space<vmem>>, %arg3: memref<1x128xf32, #tpu.memory_space<vmem>>, %arg4: memref<128x128xbf16, #tpu.memory_space<vmem>>, %arg5: memref<1x128xf32, #tpu.memory_space<vmem>>, %arg6: memref<128x128xbf16, #tpu.memory_space<vmem>>, %arg7: memref<1x128xf32, #tpu.memory_space<vmem>>, %arg8: memref<8x10xf32, #tpu.memory_space<vmem>>) attributes {dimension_semantics = [#tpu.dimension_semantics<parallel>], iteration_bounds = array<i64: 1>, scalar_prefetch = 0 : i64, scratch_operands = 0 : i64, tpu.core_type = #tpu.core_type<tc>, window_params = [{transform_indices = @transform_0, window_bounds = array<i64: 8, 784>}, {pipeline_mode = #tpu.pipeline_mode<synchronous>, transform_indices = @transform_1, window_bounds = array<i64: 784, 128>}, {pipeline_mode = #tpu.pipeline_mode<synchronous>, transform_indices = @transform_2, window_bounds = array<i64: 1, 128>}, {pipeline_mode = #tpu.pipeline_mode<synchronous>, transform_indices = @transform_3, window_bounds = array<i64: 128, 128>}, {pipeline_mode = #tpu.pipeline_mode<synchronous>, transform_indices = @transform_4, window_bounds = array<i64: 1, 128>}, {pipeline_mode = #tpu.pipeline_mode<synchronous>, transform_indices = @transform_5, window_bounds = array<i64: 128, 128>}, {pipeline_mode = #tpu.pipeline_mode<synchronous>, transform_indices = @transform_6, window_bounds = array<i64: 1, 128>}, {transform_indices = @transform_7, window_bounds = array<i64: 8, 10>}]} {
    %c0 = arith.constant 0 : index
    %c0_0 = arith.constant 0 : index
    %0 = vector.load %arg1[%c0, %c0_0] : memref<8x784xf32, #tpu.memory_space<vmem>>, vector<8x784xf32>
    %1 = arith.truncf %0 : vector<8x784xf32> to vector<8x784xbf16>
    %c0_1 = arith.constant 0 : index
    %c0_2 = arith.constant 0 : index
    %2 = vector.load %arg2[%c0_1, %c0_2] : memref<784x128xbf16, #tpu.memory_space<vmem>>, vector<784x128xbf16>
    %cst = arith.constant dense<0.000000e+00> : vector<8x128xf32>
    %3 = tpu.matmul %1, %2, %cst {dimension_numbers = #tpu.dot_dimension_numbers<[1], [0], [0], [1], [0, 0, 1, 1], [], []>} : vector<8x784xbf16>, vector<784x128xbf16>, vector<8x128xf32> -> vector<8x128xf32>
    %c0_3 = arith.constant 0 : index
    %c0_4 = arith.constant 0 : index
    %4 = vector.load %arg3[%c0_3, %c0_4] : memref<1x128xf32, #tpu.memory_space<vmem>>, vector<1x128xf32>
    %5 = vector.broadcast %4 : vector<1x128xf32> to vector<8x128xf32>
    %6 = arith.addf %3, %5 : vector<8x128xf32>
    %cst_5 = arith.constant 0.000000e+00 : f32
    %7 = vector.broadcast %cst_5 : f32 to vector<8x128xf32>
    %8 = arith.maximumf %6, %7 : vector<8x128xf32>
    %9 = arith.truncf %8 : vector<8x128xf32> to vector<8x128xbf16>
    %c0_6 = arith.constant 0 : index
    %c0_7 = arith.constant 0 : index
    %10 = vector.load %arg4[%c0_6, %c0_7] : memref<128x128xbf16, #tpu.memory_space<vmem>>, vector<128x128xbf16>
    %cst_8 = arith.constant dense<0.000000e+00> : vector<8x128xf32>
    %11 = tpu.matmul %9, %10, %cst_8 {dimension_numbers = #tpu.dot_dimension_numbers<[1], [0], [0], [1], [0, 0, 1, 1], [], []>} : vector<8x128xbf16>, vector<128x128xbf16>, vector<8x128xf32> -> vector<8x128xf32>
    %c0_9 = arith.constant 0 : index
    %c0_10 = arith.constant 0 : index
    %12 = vector.load %arg5[%c0_9, %c0_10] : memref<1x128xf32, #tpu.memory_space<vmem>>, vector<1x128xf32>
    %13 = vector.broadcast %12 : vector<1x128xf32> to vector<8x128xf32>
    %14 = arith.addf %11, %13 : vector<8x128xf32>
    %cst_11 = arith.constant 0.000000e+00 : f32
    %15 = vector.broadcast %cst_11 : f32 to vector<8x128xf32>
    %16 = arith.maximumf %14, %15 : vector<8x128xf32>
    %17 = arith.truncf %16 : vector<8x128xf32> to vector<8x128xbf16>
    %c0_12 = arith.constant 0 : index
    %c0_13 = arith.constant 0 : index
    %18 = vector.load %arg6[%c0_12, %c0_13] : memref<128x128xbf16, #tpu.memory_space<vmem>>, vector<128x128xbf16>
    %cst_14 = arith.constant dense<0.000000e+00> : vector<8x128xf32>
    %19 = tpu.matmul %17, %18, %cst_14 {dimension_numbers = #tpu.dot_dimension_numbers<[1], [0], [0], [1], [0, 0, 1, 1], [], []>} : vector<8x128xbf16>, vector<128x128xbf16>, vector<8x128xf32> -> vector<8x128xf32>
    %c0_15 = arith.constant 0 : index
    %c0_16 = arith.constant 0 : index
    %20 = vector.load %arg7[%c0_15, %c0_16] : memref<1x128xf32, #tpu.memory_space<vmem>>, vector<1x128xf32>
    %21 = vector.broadcast %20 : vector<1x128xf32> to vector<8x128xf32>
    %22 = arith.addf %19, %21 : vector<8x128xf32>
    %cst_17 = arith.constant dense<0xFF800000> : vector<8xf32>
    %23 = vector.multi_reduction <maximumf>, %22, %cst_17 [1] : vector<8x128xf32> to vector<8xf32>
    %24 = vector.shape_cast %23 : vector<8xf32> to vector<8x1xf32>
    %25 = vector.broadcast %24 : vector<8x1xf32> to vector<8x128xf32>
    %26 = arith.subf %22, %25 : vector<8x128xf32>
    %27 = math.exp %26 : vector<8x128xf32>
    %cst_18 = arith.constant dense<0.000000e+00> : vector<8xf32>
    %28 = vector.multi_reduction <add>, %27, %cst_18 [1] : vector<8x128xf32> to vector<8xf32>
    %29 = vector.shape_cast %28 : vector<8xf32> to vector<8x1xf32>
    %30 = tpu.reciprocal %29 : vector<8x1xf32> -> vector<8x1xf32>
    %31 = vector.broadcast %30 : vector<8x1xf32> to vector<8x128xf32>
    %32 = arith.mulf %27, %31 : vector<8x128xf32>
    %33 = vector.extract_strided_slice %32 {offsets = [0, 0], sizes = [8, 10], strides = [1, 1]} : vector<8x128xf32> to vector<8x10xf32>
    %c0_19 = arith.constant 0 : index
    %c0_20 = arith.constant 0 : index
    %34 = vector.load %arg8[%c0_19, %c0_20] : memref<8x10xf32, #tpu.memory_space<vmem>>, vector<8x10xf32>
    tpu.vector_store %arg8[%c0_19, %c0_20], %33 {strides = array<i32>} : memref<8x10xf32, #tpu.memory_space<vmem>>, vector<8x10xf32>,
    return
  }
  func.func @transform_0(%arg0: i32) -> (i32, i32) {
    %c0_i32 = arith.constant 0 : i32
    %c0_i32_0 = arith.constant 0 : i32
    return %arg0, %c0_i32 : i32, i32
  }
  func.func @transform_1(%arg0: i32) -> (i32, i32) {
    %c0_i32 = arith.constant 0 : i32
    %c0_i32_0 = arith.constant 0 : i32
    %c0_i32_1 = arith.constant 0 : i32
    return %c0_i32, %c0_i32_0 : i32, i32
  }
  func.func @transform_2(%arg0: i32) -> (i32, i32) {
    %c0_i32 = arith.constant 0 : i32
    %c0_i32_0 = arith.constant 0 : i32
    %c0_i32_1 = arith.constant 0 : i32
    return %c0_i32, %c0_i32_0 : i32, i32
  }
  func.func @transform_3(%arg0: i32) -> (i32, i32) {
    %c0_i32 = arith.constant 0 : i32
    %c0_i32_0 = arith.constant 0 : i32
    %c0_i32_1 = arith.constant 0 : i32
    return %c0_i32, %c0_i32_0 : i32, i32
  }
  func.func @transform_4(%arg0: i32) -> (i32, i32) {
    %c0_i32 = arith.constant 0 : i32
    %c0_i32_0 = arith.constant 0 : i32
    %c0_i32_1 = arith.constant 0 : i32
    return %c0_i32, %c0_i32_0 : i32, i32
  }
  func.func @transform_5(%arg0: i32) -> (i32, i32) {
    %c0_i32 = arith.constant 0 : i32
    %c0_i32_0 = arith.constant 0 : i32
    %c0_i32_1 = arith.constant 0 : i32
    return %c0_i32, %c0_i32_0 : i32, i32
  }
  func.func @transform_6(%arg0: i32) -> (i32, i32) {
    %c0_i32 = arith.constant 0 : i32
    %c0_i32_0 = arith.constant 0 : i32
    %c0_i32_1 = arith.constant 0 : i32
    return %c0_i32, %c0_i32_0 : i32, i32
  }
  func.func @transform_7(%arg0: i32) -> (i32, i32) {
    %c0_i32 = arith.constant 0 : i32
    %c0_i32_0 = arith.constant 0 : i32
    return %arg0, %c0_i32 : i32, i32
  }
}

</mosaic_0001>

<bundles_post_ra>
// kernel: tpu_custom_call.1
= control target key start
LH: loop header
LB: loop body
LE: loop exit
PB: predicated region body
PF: predicated region fallthrough
CT: control target
= control target key end

     0   :  { %12 = vsyncpa [#allocation3], 0  ;;  %s1459_s0 = inlined_call_operand.hbm [shape: f32[8,784], index: 0, kind: input, shape index: {}]   ;;  %s1460_s1 = inlined_call_operand.hbm [shape: bf16[784,128], index: 1, kind: input, shape index: {}]   ;;  %s1461_s2 = inlined_call_operand.vmem [shape: f32[1,128], index: 2, kind: input, shape index: {}]   ;;  %s1462_s3 = inlined_call_operand.hbm [shape: bf16[128,128], index: 3, kind: input, shape index: {}]   ;;  %s1463_s4 = inlined_call_operand.vmem [shape: f32[1,128], index: 4, kind: input, shape index: {}]   ;;  %s1464_s5 = inlined_call_operand.hbm [shape: bf16[128,128], index: 5, kind: input, shape index: {}]   ;;  %s1465_s6 = inlined_call_operand.vmem [shape: f32[1,128], index: 6, kind: input, shape index: {}]   ;;  %s1466_s7 = inlined_call_operand.hbm [shape: f32[8,10], index: 7, kind: output, shape index: {}]  }
   0x1   :  { %13 = vsyncpa [#allocation6], 0 }
   0x2   :  { %14 = vsyncpa [#allocation9], 0 }
   0x3   :  { %15 = vsyncpa [#allocation4], 0  ;;  %s1309_s24 = smov [#allocation5]   ;;  %s1191_s28 = scalar_lea.hbm %s1460_s1, 6272 }
   0x4   :  { %s31_s25 = sshll.u32 %s1309_s24, 4  ;;  %p1192_p0 = scmp.ne.s32.totalorder %s1460_s1, %s1191_s28  ;;  %s32_s25 = int_to_ptr.vmem [resolvable:$true] %s31_s25 }
   0x5   :  { %p1195_p1 = scmp.lt.u32.totalorder %s1191_s28, %s1460_s1 }
   0x7   :  { %p1197_p2 = pnand %p1195_p1, %p1192_p0 }
   0x9   :  { %1200 = shalt.err (!%p1197_p2)
}
   0xa   :  { %s1201_s10 = scalar_lea.vmem %s32_s25, 6272  ;;  %p1206_p4 = scmp.lt.s32.totalorder %s32_s25, %s32_s25 }
   0xb   :  { %p1202_p3 = scmp.ne.s32.totalorder %s32_s25, %s1201_s10  ;;  %p1207_p5 = scmp.lt.s32.totalorder %s1201_s10, %s1201_s10 }
   0xd   :  { %p1208_p6 = por %p1207_p5, %p1206_p4 }
   0xf   :  { %p1209_p7 = pnand %p1208_p6, %p1202_p3 }
  0x11   :  { %1212 = shalt.err (!%p1209_p7)
}
  0x12   :  { %s1310_s11 = smov 64   ;;  %s1311_s12 = smov 4  }
  0x13   :  { %37 = dma.hbm_to_vmem [thread:$0]  %s1460_s1, 6272, %s32_s25, [#allocation6], %s1310_s11, %s1310_s11, %s1311_s12  }
  0x14   :  { %s1312_s15 = smov [#allocation2]   ;;  %s1313_s17 = smov [#allocation7]  }
  0x15   :  { %s22_s16 = sshll.u32 %s1312_s15, 4  ;;  %s45_s18 = sshll.u32 %s1313_s17, 4  ;;  %s23_s16 = int_to_ptr.vmem [resolvable:$true] %s22_s16  ;;  %s46_s18 = int_to_ptr.vmem [resolvable:$true] %s45_s18 }
  0x16   :  { %s1213_s21 = scalar_lea.hbm %s1459_s0, 896 }
  0x17   :  { %p1214_p8 = scmp.ne.s32.totalorder %s1459_s0, %s1213_s21  ;;  %p1217_p9 = scmp.lt.u32.totalorder %s1213_s21, %s1459_s0 }
  0x19   :  { %p1219_p10 = pnand %p1217_p9, %p1214_p8 }
  0x1b   :  { %1222 = shalt.err (!%p1219_p10)
}
  0x1c   :  { %s1223_s1 = scalar_lea.vmem %s23_s16, 896  ;;  %p1228_p12 = scmp.lt.s32.totalorder %s23_s16, %s23_s16 }
  0x1d   :  { %p1224_p11 = scmp.ne.s32.totalorder %s23_s16, %s1223_s1  ;;  %p1229_p13 = scmp.lt.s32.totalorder %s1223_s1, %s1223_s1 }
  0x1f   :  { %p1230_p0 = por %p1229_p13, %p1228_p12 }
  0x21   :  { %p1231_p1 = pnand %p1230_p0, %p1224_p11 }
  0x23   :  { %1234 = shalt.err (!%p1231_p1)
}
  0x24   :  { %25 = dma.hbm_to_vmem [thread:$0]  %s1459_s0, 896, %s23_s16, [#allocation3]  }
  0x25   :  { %s1235_s30 = scalar_lea.hbm %s1462_s3, 1024 }
  0x26   :  { %p1236_p2 = scmp.ne.s32.totalorder %s1462_s3, %s1235_s30  ;;  %p1239_p3 = scmp.lt.u32.totalorder %s1235_s30, %s1462_s3 }
  0x28   :  { %p1241_p4 = pnand %p1239_p3, %p1236_p2 }
  0x2a   :  { %1244 = shalt.err (!%p1241_p4)
}
  0x2b   :  { %s1245_s14 = scalar_lea.vmem %s46_s18, 1024  ;;  %p1250_p6 = scmp.lt.s32.totalorder %s46_s18, %s46_s18 }
  0x2c   :  { %p1246_p5 = scmp.ne.s32.totalorder %s46_s18, %s1245_s14  ;;  %p1251_p7 = scmp.lt.s32.totalorder %s1245_s14, %s1245_s14 }
  0x2e   :  { %p1252_p8 = por %p1251_p7, %p1250_p6 }
  0x30   :  { %p1253_p9 = pnand %p1252_p8, %p1246_p5 }
  0x32   :  { %1256 = shalt.err (!%p1253_p9)
}
  0x33   :  { %51 = dma.hbm_to_vmem [thread:$0]  %s1462_s3, 1024, %s46_s18, [#allocation6], %s1310_s11, %s1310_s11, %s1311_s12  }
  0x34   :  { %s1314_s16 = smov [#allocation8]   ;;  %s1257_s21 = scalar_lea.hbm %s1464_s5, 1024 }
  0x35   :  { %s59_s17 = sshll.u32 %s1314_s16, 4  ;;  %p1258_p10 = scmp.ne.s32.totalorder %s1464_s5, %s1257_s21  ;;  %s60_s17 = int_to_ptr.vmem [resolvable:$true] %s59_s17 }
  0x36   :  { %p1261_p11 = scmp.lt.u32.totalorder %s1257_s21, %s1464_s5 }
  0x38   :  { %p1263_p12 = pnand %p1261_p11, %p1258_p10 }
  0x3a   :  { %1266 = shalt.err (!%p1263_p12)
}
  0x3b   :  { %s1267_s1 = scalar_lea.vmem %s60_s17, 1024  ;;  %p1272_p0 = scmp.lt.s32.totalorder %s60_s17, %s60_s17 }
  0x3c   :  { %p1268_p13 = scmp.ne.s32.totalorder %s60_s17, %s1267_s1  ;;  %p1273_p1 = scmp.lt.s32.totalorder %s1267_s1, %s1267_s1 }
  0x3e   :  { %p1274_p2 = por %p1273_p1, %p1272_p0 }
  0x40   :  { %p1275_p3 = pnand %p1274_p2, %p1268_p13 }
  0x42   :  { %1278 = shalt.err (!%p1275_p3)
}
  0x43   :  { %65 = dma.hbm_to_vmem [thread:$0]  %s1464_s5, 1024, %s60_s17, [#allocation9], %s1310_s11, %s1310_s11, %s1311_s12  }
  0x44   :  { %1301 = dma.done.wait [#allocation3], 896  }
  0x45   :  { %1302 = vsyncadd [#allocation3], 4294966400 }
  0x46   :  { %1303 = dma.done.wait [#allocation6], 7296  }
  0x47   :  { %1304 = vsyncadd [#allocation6], 4294960000 }
  0x48   :  { %1305 = dma.done.wait [#allocation9], 1024  }
  0x49   :  { %1306 = vsyncadd [#allocation9], 4294966272  ;;  %v1122_v0 = vld [vmem:[#allocation5 + $0x40] sm:$0xff]   ;;  %v1126_v4 = vld [vmem:[#allocation5 + $0x48] sm:$0xff]   ;;  %v1315_v44 = vmov 0.0   ;;  %vm1316_vm0 = vmmov 0  }
  0x4a   :  { %v1123_v1 = vld [vmem:[#allocation5] sm:$0xff]   ;;  %981 = vmatprep.subr.bf16.mxu0 %v1122_v0  ;;  %v1127_v5 = vld [vmem:[#allocation5 + $0x8] sm:$0xff]   ;;  %v1130_v8 = vld [vmem:[#allocation5 + $0x50] sm:$0xff]   ;;  %vm494_vm1 = vcmask 130048   ;;  %vm893_vm2 = vcmask 80896  }
  0x4b   :  { %v1124_v2 = vld [vmem:[#allocation5 + $0xc0] sm:$0xff]   ;;  %982 = vmatpush3.bf16.msra.mxu0 %v1123_v1  ;;  %v1128_v6 = vld [vmem:[#allocation5 + $0xc8] sm:$0xff]   ;;  %v1131_v9 = vld [vmem:[#allocation5 + $0x10] sm:$0xff]  }
  0x4c   :  { %v1125_v3 = vld [vmem:[#allocation5 + $0x80] sm:$0xff]   ;;  %1003 = vmatprep.subr.bf16.mxu1 %v1124_v2  ;;  %983 = vmatprep.subr.bf16.mxu0 %v1126_v4  ;;  %v1129_v7 = vld [vmem:[#allocation5 + $0x88] sm:$0xff]   ;;  %v1132_v10 = vld [vmem:[#allocation5 + $0xd0] sm:$0xff]  }
  0x4d   :  { %1004 = vmatpush3.bf16.msra.mxu1 %v1125_v3  ;;  %v1133_v11 = vld [vmem:[#allocation5 + $0x90] sm:$0xff]   ;;  %v1134_v12 = vld [vmem:[#allocation5 + $0x58] sm:$0xff]   ;;  %v1138_v16 = vld [vmem:[#allocation5 + $0x60] sm:$0xff]  }
  0x4e   :  { %1005 = vmatprep.subr.bf16.mxu1 %v1128_v6  ;;  %v1135_v13 = vld [vmem:[#allocation5 + $0x18] sm:$0xff]   ;;  %v1139_v17 = vld [vmem:[#allocation5 + $0x20] sm:$0xff]   ;;  %v1142_v20 = vld [vmem:[#allocation5 + $0x68] sm:$0xff]  }
  0x4f   :  { %984 = vmatpush3.bf16.msra.mxu0 %v1127_v5  ;;  %v1136_v14 = vld [vmem:[#allocation5 + $0xd8] sm:$0xff]   ;;  %v1140_v18 = vld [vmem:[#allocation5 + $0xe0] sm:$0xff]   ;;  %v1143_v21 = vld [vmem:[#allocation5 + $0x28] sm:$0xff]  }
  0x50   :  { %985 = vmatprep.subr.bf16.mxu0 %v1130_v8  ;;  %v1137_v15 = vld [vmem:[#allocation5 + $0x98] sm:$0xff]   ;;  %v1141_v19 = vld [vmem:[#allocation5 + $0xa0] sm:$0xff]   ;;  %v1144_v22 = vld [vmem:[#allocation5 + $0xe8] sm:$0xff]  }
  0x51   :  { %1006 = vmatpush3.bf16.msra.mxu1 %v1129_v7  ;;  %v1145_v23 = vld [vmem:[#allocation5 + $0xa8] sm:$0xff]   ;;  %v1146_v24 = vld [vmem:[#allocation5 + $0x70] sm:$0xff]   ;;  %v1150_v28 = vld [vmem:[#allocation5 + $0x78] sm:$0xff]  }
  0x52   :  { %1007 = vmatprep.subr.bf16.mxu1 %v1132_v10  ;;  %v1147_v25 = vld [vmem:[#allocation5 + $0x30] sm:$0xff]   ;;  %v1151_v29 = vld [vmem:[#allocation5 + $0x38] sm:$0xff]   ;;  %v81_v34 = vld [vmem:[#allocation2] sm:$0xff] }
  0x53   :  { %986 = vmatpush3.bf16.msra.mxu0 %v1131_v9  ;;  %v1148_v26 = vld [vmem:[#allocation5 + $0xf0] sm:$0xff]   ;;  %v1152_v30 = vld [vmem:[#allocation5 + $0xf8] sm:$0xff]   ;;  %v88_v35 = vpack.c.bf16 %v81_v34, %v81_v34  ;;  %v1154_v36 = vld [vmem:[#allocation5 + $0x140] sm:$0xff]  }
  0x54   :  { %987 = vmatprep.subr.bf16.mxu0 %v1134_v12  ;;  %v1149_v27 = vld [vmem:[#allocation5 + $0xb0] sm:$0xff]   ;;  %v1153_v33 = vld [vmem:[#allocation5 + $0xb8] sm:$0xff]   ;;  %v84_v37 = vld [vmem:[#allocation2 + $0x18] sm:$0xff] }
  0x55   :  { %1008 = vmatpush3.bf16.msra.mxu1 %v1133_v11  ;;  %v82_v31 = vld [vmem:[#allocation2 + $0x8] sm:$0xff]  ;;  %v91_v38 = vpack.c.bf16 %v84_v37, %v84_v37  ;;  %v1155_v39 = vld [vmem:[#allocation5 + $0x100] sm:$0xff]   ;;  %v83_v40 = vld [vmem:[#allocation2 + $0x10] sm:$0xff] }
  0x56   :  { %1009 = vmatprep.subr.bf16.mxu1 %v1136_v14  ;;  %v89_v32 = vpack.c.bf16 %v82_v31, %v82_v31  ;;  %v90_v41 = vpack.c.bf16 %v83_v40, %v83_v40  ;;  %v1156_v42 = vld [vmem:[#allocation5 + $0x148] sm:$0xff]   ;;  %v1158_v45 = vld [vmem:[#allocation5 + $0x150] sm:$0xff]   ;;  %v1160_v47 = vld [vmem:[#allocation5 + $0x158] sm:$0xff]  }
  0x57   :  { %988 = vmatpush3.bf16.msra.mxu0 %v1135_v13  ;;  %570 = vmatprep.mubr.bf16.mxu1 %v91_v38  ;;  %v1157_v43 = vld [vmem:[#allocation5 + $0x108] sm:$0xff]   ;;  %v1159_v46 = vld [vmem:[#allocation5 + $0x110] sm:$0xff]   ;;  %v1161_v48 = vld [vmem:[#allocation5 + $0x118] sm:$0xff]  }
  0x58   :  { %989 = vmatprep.subr.bf16.mxu0 %v1138_v16  ;;  %530 = vmatprep.mubr.bf16.mxu0 %v89_v32  ;;  %v1162_v49 = vld [vmem:[#allocation5 + $0x160] sm:$0xff]   ;;  %v1164_v51 = vld [vmem:[#allocation5 + $0x168] sm:$0xff]   ;;  %v86_v54 = vld [vmem:[#allocation2 + $0x28] sm:$0xff] }
  0x59   :  { %1010 = vmatpush3.bf16.msra.mxu1 %v1137_v15  ;;  %v1163_v50 = vld [vmem:[#allocation5 + $0x120] sm:$0xff]   ;;  %v1165_v52 = vld [vmem:[#allocation5 + $0x128] sm:$0xff]   ;;  %v1166_v55 = vld [vmem:[#allocation5 + $0x170] sm:$0xff]   ;;  %v93_v56 = vpack.c.bf16 %v86_v54, %v86_v54 }
  0x5a   :  { %1011 = vmatprep.subr.bf16.mxu1 %v1140_v18  ;;  %v1170_v53 = vld [vmem:[#allocation5 + $0x180] sm:$0xff]   ;;  %v87_v57 = vld [vmem:[#allocation2 + $0x30] sm:$0xff]  ;;  %v1167_v59 = vld [vmem:[#allocation5 + $0x130] sm:$0xff]  }
  0x5b   :  { %990 = vmatpush3.bf16.msra.mxu0 %v1139_v17  ;;  %v94_v58 = vpack.c.bf16 %v87_v57, %v87_v57  ;;  %v1168_v60 = vld [vmem:[#allocation5 + $0x178] sm:$0xff]   ;;  %v85_v62 = vld [vmem:[#allocation2 + $0x20] sm:$0xff]  ;;  %v1172_v1 = vld [vmem:[#allocation7 + $0x8] sm:$0xff]  }
  0x5c   :  { %991 = vmatprep.subr.bf16.mxu0 %v1142_v20  ;;  %v1169_v61 = vld [vmem:[#allocation5 + $0x138] sm:$0xff]   ;;  %v92_v63 = vpack.c.bf16 %v85_v62, %v85_v62  ;;  %v1171_v0 = vld [vmem:[#allocation7] sm:$0xff]   ;;  %v1174_v3 = vld [vmem:[#allocation7 + $0x18] sm:$0xff]  }
  0x5d   :  { %1012 = vmatpush3.bf16.msra.mxu1 %v1141_v19  ;;  %v1173_v2 = vld [vmem:[#allocation7 + $0x10] sm:$0xff]   ;;  %v1175_v4 = vld [vmem:[#allocation7 + $0x20] sm:$0xff]   ;;  %v1176_v5 = vld [vmem:[#allocation7 + $0x28] sm:$0xff]  }
  0x5e   :  { %1013 = vmatprep.subr.bf16.mxu1 %v1144_v22  ;;  %v1177_v6 = vld [vmem:[#allocation7 + $0x30] sm:$0xff]   ;;  %v1178_v7 = vld [vmem:[#allocation7 + $0x38] sm:$0xff]   ;;  %v1179_v8 = vld [vmem:[#allocation8] sm:$0xff]  }
  0x5f   :  { %992 = vmatpush3.bf16.msra.mxu0 %v1143_v21  ;;  %v1180_v9 = vld [vmem:[#allocation8 + $0x8] sm:$0xff]   ;;  %v1181_v10 = vld [vmem:[#allocation8 + $0x10] sm:$0xff]   ;;  %v1182_v11 = vld [vmem:[#allocation8 + $0x18] sm:$0xff]  }
  0x60   :  { %993 = vmatprep.subr.bf16.mxu0 %v1146_v24  ;;  %v1183_v12 = vld [vmem:[#allocation8 + $0x20] sm:$0xff]   ;;  %v1184_v13 = vld [vmem:[#allocation8 + $0x28] sm:$0xff]   ;;  %v1185_v40 = vld [vmem:[#allocation8 + $0x30] sm:$0xff]  }
  0x61   :  { %1014 = vmatpush3.bf16.msra.mxu1 %v1145_v23  ;;  %v912_v15 = vld [vmem:[%s1461_s2] ss:$0 sm:$0xff] }
  0x62   :  { %1015 = vmatprep.subr.bf16.mxu1 %v1148_v26 }
  0x63   :  { %994 = vmatpush3.bf16.msra.mxu0 %v1147_v25 }
  0x64   :  { %995 = vmatprep.subr.bf16.mxu0 %v1150_v28 }
  0x65   :  { %1016 = vmatpush3.bf16.msra.mxu1 %v1149_v27 }
  0x66   :  { %1017 = vmatprep.subr.bf16.mxu1 %v1152_v30 }
  0x67   :  { %996 = vmatpush3.bf16.msra.mxu0 %v1151_v29 }
  0x68   :  { %1025 = vmatprep.subr.bf16.mxu0 %v1154_v36 }
  0x69   :  { %1018 = vmatpush3.bf16.msra.mxu1 %v1153_v33 }
  0x6a   :  { %531 = vmatmul.mubr.bf16.vlgmr.msra.gmra.mrb[0].mxu0 %v88_v35  ;;  %1067 = vmatprep.subr.bf16.mxu1 %v1315_v44 }
  0x6b   :  { %1026 = vmatpush3.bf16.msra.mxu0 %v1155_v39  ;;  %610 = vmatprep.mubr.bf16.mxu0 %v93_v56 }
  0x6c   :  { %571 = vmatmul.mubr.bf16.vlgmr.msra.gmra.mrb[0].mxu1 %v90_v41  ;;  %1027 = vmatprep.subr.bf16.mxu0 %v1156_v42  ;;  %v1186_v41 = vld [vmem:[#allocation8 + $0x38] sm:$0xff]   ;;  %v963_v42 = vld [vmem:[%s1463_s4] ss:$0 sm:$0xff]  ;;  %s1317_s4 = smov [#allocation10]  }
  0x6d   :  { %1069 = vmatprep.mubr.msk.bf16.mxu1 %vm1316_vm0, %v1315_v44  ;;  %1068 = vmatpush3.bf16.msra.mxu1 %v1170_v53  ;;  %s901_s28 = sshll.u32 %s1317_s4, 4  ;;  %s902_s28 = int_to_ptr.vmem [resolvable:$true] %s901_s28 }
  0x6e   :  { %1073 = vmatprep.subr.bf16.mxu1 %v1315_v44  ;;  %p1284_p5 = scmp.lt.s32.totalorder %s902_s28, %s902_s28 }
  0x6f   :  { %1028 = vmatpush3.bf16.msra.mxu0 %v1157_v43 }
  0x70   :  { %1029 = vmatprep.subr.bf16.mxu0 %v1158_v45 }
  0x73   :  { %1030 = vmatpush3.bf16.msra.mxu0 %v1159_v46 }
  0x74   :  { %1031 = vmatprep.subr.bf16.mxu0 %v1160_v47  ;;  %1070 = vmatmul.mubr.msk.bf16.vlgmr.msra.gmra.mrb[4].mxu1 %vm494_vm1, %v94_v58 }
  0x75   :  { %1089 = vmatprep.mubr.msk.bf16.mxu1 %vm1316_vm0, %v1315_v44  ;;  %1074 = vmatpush3.bf16.msra.mxu1 %v1171_v0 }
  0x76   :  { %1075 = vmatprep.subr.bf16.mxu1 %v1315_v44 }
  0x77   :  { %1032 = vmatpush3.bf16.msra.mxu0 %v1161_v48 }
  0x78   :  { %1033 = vmatprep.subr.bf16.mxu0 %v1162_v49 }
  0x79   :  { %1076 = vmatpush3.bf16.msra.mxu1 %v1172_v1 }
  0x7a   :  { %1077 = vmatprep.subr.bf16.mxu1 %v1315_v44 }
  0x7b   :  { %1034 = vmatpush3.bf16.msra.mxu0 %v1163_v50 }
  0x7c   :  { %1035 = vmatprep.subr.bf16.mxu0 %v1164_v51  ;;  %v972_v51 = vld [vmem:[%s1465_s6] ss:$0 sm:$0xff]  ;;  %s1279_s6 = scalar_lea.vmem %s902_s28, 128 }
  0x7d   :  { %1078 = vmatpush3.bf16.msra.mxu1 %v1173_v2  ;;  %p1280_p4 = scmp.ne.s32.totalorder %s902_s28, %s1279_s6  ;;  %p1285_p6 = scmp.lt.s32.totalorder %s1279_s6, %s1279_s6 }
  0x7e   :  { %1079 = vmatprep.subr.bf16.mxu1 %v1315_v44 }
  0x7f   :  { %1036 = vmatpush3.bf16.msra.mxu0 %v1165_v52  ;;  %p1286_p7 = por %p1285_p6, %p1284_p5 }
  0x80   :  { %1037 = vmatprep.subr.bf16.mxu0 %v1166_v55 }
  0x81   :  { %1080 = vmatpush3.bf16.msra.mxu1 %v1174_v3  ;;  %p1287_p8 = pnand %p1286_p7, %p1280_p4 }
  0x82   :  { %1081 = vmatprep.subr.bf16.mxu1 %v1315_v44 }
  0x83   :  { %1038 = vmatpush3.bf16.msra.mxu0 %v1167_v59 }
  0x84   :  { %1039 = vmatprep.subr.bf16.mxu0 %v1168_v60 }
  0x85   :  { %1082 = vmatpush3.bf16.msra.mxu1 %v1175_v4 }
  0x86   :  { %1083 = vmatprep.subr.bf16.mxu1 %v1315_v44 }
  0x87   :  { %1040 = vmatpush3.bf16.msra.mxu0 %v1169_v61 }
  0x88   :  { %1093 = vmatprep.subr.bf16.mxu0 %v1315_v44 }
  0x89   :  { %1084 = vmatpush3.bf16.msra.mxu1 %v1176_v5 }
  0x8a   :  { %611 = vmatmul.mubr.bf16.vlgmr.msra.gmra.mrb[4].mxu0 %v92_v63  ;;  %1085 = vmatprep.subr.bf16.mxu1 %v1315_v44 }
  0x8b   :  { %1109 = vmatprep.mubr.msk.bf16.mxu0 %vm1316_vm0, %v1315_v44  ;;  %1094 = vmatpush3.bf16.msra.mxu0 %v1179_v8 }
  0x8c   :  { %1095 = vmatprep.subr.bf16.mxu0 %v1315_v44 }
  0x8d   :  { %1086 = vmatpush3.bf16.msra.mxu1 %v1177_v6 }
  0x8e   :  { %1087 = vmatprep.subr.bf16.mxu1 %v1315_v44 }
  0x8f   :  { %1096 = vmatpush3.bf16.msra.mxu0 %v1180_v9 }
  0x90   :  { %1097 = vmatprep.subr.bf16.mxu0 %v1315_v44 }
  0x91   :  { %1088 = vmatpush3.bf16.msra.mxu1 %v1178_v7 }
  0x93   :  { %1098 = vmatpush3.bf16.msra.mxu0 %v1181_v10 }
  0x94   :  { %1099 = vmatprep.subr.bf16.mxu0 %v1315_v44 }
  0x97   :  { %1100 = vmatpush3.bf16.msra.mxu0 %v1182_v11 }
  0x98   :  { %1101 = vmatprep.subr.bf16.mxu0 %v1315_v44 }
  0x9b   :  { %1102 = vmatpush3.bf16.msra.mxu0 %v1183_v12 }
  0x9c   :  { %1103 = vmatprep.subr.bf16.mxu0 %v1315_v44 }
  0x9f   :  { %1104 = vmatpush3.bf16.msra.mxu0 %v1184_v13 }
  0xa0   :  { %1105 = vmatprep.subr.bf16.mxu0 %v1315_v44 }
  0xa3   :  { %1106 = vmatpush3.bf16.msra.mxu0 %v1185_v40 }
  0xa4   :  { %1107 = vmatprep.subr.bf16.mxu0 %v1315_v44 }
  0xa7   :  { %1108 = vmatpush3.bf16.msra.mxu0 %v1186_v41 }
 0x13d   :  { %v997_v14 = vpop.f32.mrb[0].mxu0 }
 0x13e   :  { %v998_v16 = vpop.f32.mrb[1].mxu0 }
 0x13f   :  { %v999_v17 = vadd.f32 %v998_v16, %v997_v14  ;;  %v1000_v18 = vpop.f32.mrb[2].mxu0  ;;  %v1019_v19 = vpop.f32.mrb[0].mxu1 }
 0x140   :  { %v1001_v20 = vpop.f32.mrb[3].mxu0  ;;  %v1020_v22 = vpop.f32.mrb[1].mxu1 }
 0x141   :  { %v533_v21 = vadd.f32 %v999_v17, %v912_v15  ;;  %v1021_v23 = vadd.f32 %v1020_v22, %v1019_v19  ;;  %v1022_v24 = vpop.f32.mrb[2].mxu1 }
 0x142   :  { %v1023_v25 = vpop.f32.mrb[3].mxu1 }
 0x143   :  { %v573_v26 = vadd.f32 %v1021_v23, %v533_v21 }
 0x147   :  { %v652_v27 = vpop.f32.mrb[4].mxu1 }
 0x148   :  { %v1071_v28 = vpop.f32.mrb[5].mxu1 }
 0x149   :  { %v655_v29 = vpop.f32.mrb[6].mxu1 }
 0x14a   :  { %v1072_v30 = vpop.f32.mrb[7].mxu1 }
 0x15d   :  { %v1041_v31 = vpop.f32.mrb[4].mxu0 }
 0x15e   :  { %v1042_v32 = vpop.f32.mrb[5].mxu0 }
 0x15f   :  { %v1043_v33 = vadd.f32 %v1042_v32, %v1041_v31  ;;  %v1044_v34 = vpop.f32.mrb[6].mxu0 }
 0x160   :  { %v1045_v35 = vpop.f32.mrb[7].mxu0 }
 0x161   :  { %v613_v36 = vadd.f32 %v1043_v33, %v573_v26 }
 0x163   :  { %v653_v37 = vadd.f32 %v652_v27, %v613_v36 }
 0x165   :  { %v658_v38 = vmax.f32 %v653_v37, 0.0 }
 0x167   :  { %v659_v39 = vpack.c.bf16 %v658_v38, %v658_v38 }
 0x169   :  { %1090 = vmatmul.mubr.bf16.vlgmr.msra.gmra.mrb[8].mxu1 %v659_v39 }
 0x23c   :  { %v765_v43 = vpop.f32.mrb[8].mxu1 }
 0x23d   :  { %v766_v45 = vadd.f32 %v963_v42, %v765_v43  ;;  %v1091_v46 = vpop.f32.mrb[9].mxu1 }
 0x23e   :  { %v768_v47 = vpop.f32.mrb[10].mxu1 }
 0x23f   :  { %v771_v48 = vmax.f32 %v766_v45, 0.0  ;;  %v1092_v49 = vpop.f32.mrb[11].mxu1 }
 0x241   :  { %v772_v50 = vpack.c.bf16 %v771_v48, %v771_v48 }
 0x243   :  { %1110 = vmatmul.mubr.bf16.vlgmr.msra.gmra.mrb[8].mxu0 %v772_v50 }
 0x316   :  { %v878_v52 = vpop.f32.mrb[8].mxu0 }
 0x317   :  { %v879_v44 = vadd.f32 %v972_v51, %v878_v52  ;;  %v1111_v53 = vpop.f32.mrb[9].mxu0 }
 0x318   :  { %v881_v54 = vpop.f32.mrb[10].mxu0 }
 0x319   :  { %884 = vmax.xlane.f32.xlu0 %v879_v44  ;;  %v1112_v55 = vpop.f32.mrb[11].mxu0 }
 0x3a6   :  { %v885_v56 = vpop.xlane.xlu0 %884 }
 0x3a7   :  { %v886_v57 = vsub.f32 %v879_v44, %v885_v56 }
 0x3a9   :  { %v887_v58 = vmul.f32 1.442695, %v886_v57 }
 0x3ab   :  { %1187 = vpow2.f32 %v887_v58 }
 0x3b5   :  { %v1188_v59 = vpop.eup %1187 }
 0x3b6   :  { %889 = vadd.xlane.f32.xlu0 %v1188_v59 }
 0x443   :  { %v890_v60 = vpop.xlane.xlu0 %889 }
 0x444   :  { %1189 = vrcp.f32 %v890_v60 }
 0x44e   :  { %v1190_v61 = vpop.eup %1189 }
 0x44f   :  { %v892_v62 = vmul.f32 %v1190_v61, %v1188_v59 }
 0x451   :  { %894 = vst.msk [vmem:[#allocation10] sm:$0xff] %vm893_vm2, %v892_v62 }
 0x452   :  { %1290 = shalt.err (!%p1287_p8)
}
 0x453   :  { %s1291_s8 = scalar_lea.hbm %s1466_s7, 128 }
 0x454   :  { %p1292_p9 = scmp.ne.s32.totalorder %s1466_s7, %s1291_s8  ;;  %p1295_p10 = scmp.lt.u32.totalorder %s1291_s8, %s1466_s7 }
 0x456   :  { %p1297_p11 = pnand %p1295_p10, %p1292_p9 }
 0x458   :  { %1300 = shalt.err (!%p1297_p11)
}
 0x459   :  { %904 = dma.vmem_to_hbm [thread:$0]  %s902_s28, 128, %s1466_s7, [#allocation4]  }
 0x45a   :  { %1307 = dma.done.wait [#allocation4], 128  }
 0x45b   :  { %1308 = vsyncadd [#allocation4], 4294967168 }
 0x45c   :  { %908 = vsyncpa [#allocation3], 1 }
 0x45d   :  { %909 = vsyncpa [#allocation6], 1 }
 0x45e   :  { %910 = vsyncpa [#allocation9], 1 }
 0x45f   :  { %911 = vsyncpa [#allocation4], 1 }

</bundles_post_ra>
